<compile_context>
chip_gen: v7x
topology: tpu7x:2x2x1
jax: 0.10.0
libtpu: 0.0.40
codegen_flags: <defaults>
</compile_context>

<pallas_src>
import jax
import jax.numpy as jnp
from jax.experimental import pallas as pl
from jax.experimental.pallas import tpu as pltpu

EPS = 1e-5


def _round_up(a, b):
    return (a + b - 1) // b * b


def _tpu_vmem_capacity():
    try:
        return int(pltpu.get_tpu_info().vmem_capacity_bytes)
    except Exception:
        return 64 << 20  # conservative fallback (v7x-sized)


_VMEM_CAP = _tpu_vmem_capacity()
_VMEM_LIMIT = min(_VMEM_CAP // 2, 64 << 20)   # explicit scoped-VMEM limit
_TILE_BUDGET = _VMEM_LIMIT // 2               # target per-grid-step working set


def _silu(y):
    # y * sigmoid(y); exp and the approximate reciprocal both run on the EUP.
    return y * pl.reciprocal(1.0 + jnp.exp(-y), approx=True)


# ---------------------------------------------------------------------------
# Pallas kernels
# ---------------------------------------------------------------------------
def _conv1x1_bn_silu_kernel(x_ref, w_ref, s_ref, b_ref, o_ref):
    # x_ref: (TM, Cin) bf16   w_ref: (Cin, Cout) bf16   s_ref/b_ref: (1, Cout)
    y = jnp.dot(x_ref[...], w_ref[...], preferred_element_type=jnp.float32)
    y = y * s_ref[...] + b_ref[...]                  # folded BatchNorm (eval)
    o_ref[...] = _silu(y).astype(o_ref.dtype)


def _bottleneck_kernel(xc_ref, xt_ref, xb_ref, w1_ref, s1_ref, b1_ref,
                       w2_ref, s2_ref, b2_ref, o_ref, h3_ref):
    # Fused Bottleneck (1x1 conv+BN+SiLU -> 3x3 conv+BN+SiLU -> residual) for
    # one row tile of one batch image.
    #   xc_ref : (1, TH, W, Ch) bf16  centre rows (also the residual source)
    #   xt_ref : (1, 1, W, Ch)  bf16  halo row above the tile (clamped at top)
    #   xb_ref : (1, 1, W, Ch)  bf16  halo row below the tile (clamped at bot.)
    #   w1_ref : (Ch, Cb) bf16        cv1 1x1 weight
    #   w2_ref : (9*Cb, Ch) bf16      cv2 3x3 weight, (ky, kx, cin) flattened
    #   h3_ref : (TH+2, W+2, Cb) f32  scratch: zero-padded cv1 activation
    #   o_ref  : (1, TH, W, Ch)
    _, TH, W, ch = xc_ref.shape
    cb = w1_ref.shape[1]
    r = pl.program_id(1)

    def cv1(x2d):  # 1x1 conv + BN + SiLU, rows on the sublane axis
        t = jnp.dot(x2d, w1_ref[...], preferred_element_type=jnp.float32)
        return _silu(t * s1_ref[...] + b1_ref[...])

    h_c = cv1(xc_ref[0].reshape(TH * W, ch)).reshape(TH, W, cb)
    h_t = cv1(xt_ref[0, 0]).reshape(1, W, cb)
    h_b = cv1(xb_ref[0, 0]).reshape(1, W, cb)

    # The 3x3 conv zero-pads cv1's OUTPUT: halo rows that fall outside the
    # image and the left/right ring columns must be zero.  Ring handling is
    # done with tiny slice stores / row-sized selects, not a full-tensor mask.
    h_t = jnp.where(r > 0, h_t, 0.0)
    h_b = jnp.where(r < pl.num_programs(1) - 1, h_b, 0.0)
    h3_ref[1:TH + 1, 1:W + 1, :] = h_c
    h3_ref[0:1, 1:W + 1, :] = h_t
    h3_ref[TH + 1:TH + 2, 1:W + 1, :] = h_b
    zcol = jnp.zeros((TH + 2, 1, cb), jnp.float32)
    h3_ref[:, 0:1, :] = zcol
    h3_ref[:, W + 1:W + 2, :] = zcol

    # im2col: the 9 shifted taps concatenated on the lane axis -> ONE K=9*Cb
    # matmul for the 3x3 conv (keeps the MXU systolic array full).
    patches = jnp.concatenate(
        [h3_ref[dy:dy + TH, dx:dx + W, :] for dy in range(3) for dx in range(3)],
        axis=-1).reshape(TH * W, 9 * cb)
    y = jnp.dot(patches.astype(jnp.bfloat16), w2_ref[...],
                preferred_element_type=jnp.float32)              # (TH*W, Ch)
    y = _silu(y * s2_ref[...] + b2_ref[...]).reshape(TH, W, ch)

    o_ref[0] = (y + xc_ref[0].astype(jnp.float32)).astype(o_ref.dtype)


def _make_cv2_kernel(n_br):
    # Final cv2 on the (virtual) channel concat of the n_br branches, computed
    # as sum_i(y_i @ W_i) -- neither the concat nor a weight slice is built.
    def kernel(*refs):
        y_refs = refs[:n_br]
        w_refs = refs[n_br:2 * n_br]
        s_ref, b_ref, o_ref = refs[2 * n_br:]
        acc = jnp.dot(y_refs[0][...], w_refs[0][...],
                      preferred_element_type=jnp.float32)
        for i in range(1, n_br):
            acc = acc + jnp.dot(y_refs[i][...], w_refs[i][...],
                                preferred_element_type=jnp.float32)
        y = acc * s_ref[...] + b_ref[...]
        o_ref[...] = _silu(y).astype(o_ref.dtype)
    return kernel


# ---------------------------------------------------------------------------
# Tile-size selection (per TPU generation, from the VMEM budget)
# ---------------------------------------------------------------------------
def _pick_tm(M, in_bytes_per_row, out_bytes_per_row, budget):
    """Rows per grid step for the flattened-spatial 1x1-conv kernels."""
    per_row = 2 * (in_bytes_per_row + out_bytes_per_row)   # double-buffered
    target = int(max(512, min(4096, budget // max(per_row, 1))))
    target -= target % 8
    m8 = _round_up(M, 8)
    if m8 <= target:
        return m8, m8
    lo = max(target // 2, 8)
    for tm in range(target, lo - 1, -8):      # prefer an exact divisor: no tail pad
        if M % tm == 0:
            return tm, M
    return target, _round_up(M, target)


def _pick_th(H, W, ch, cb, n_batch, budget):
    """Row-tile height for the fused bottleneck."""
    def working_set(th):
        hp, wp = th + 2, W + 2
        return (8 * th * W * ch                 # in + out blocks bf16, 2x buffered
                + hp * wp * cb * 4              # padded cv1 slab scratch (f32)
                + th * W * 9 * cb * (4 + 2)     # im2col patches f32 + bf16 copy
                + th * W * ch * 4)              # cv2 f32 accumulator
    divisors = [d for d in range(1, H + 1) if H % d == 0]
    fitting = [d for d in divisors if working_set(d) <= budget] or [1]
    th = fitting[-1]
    if n_batch * (H // th) < 2:                 # keep both v7x TensorCores busy
        smaller = [d for d in fitting if n_batch * (H // d) >= 2]
        if smaller:
            th = smaller[-1]
    return th


# ---------------------------------------------------------------------------
# Wrappers (JAX glue around pallas_call)
# ---------------------------------------------------------------------------
def _bn_fold(p):
    scale = p["gamma"] / jnp.sqrt(p["var"] + EPS)
    shift = p["beta"] - p["mean"] * scale
    return scale.reshape(1, -1), shift.reshape(1, -1)


def conv1x1_bn_silu(x_nhwc, p, out_dtype=jnp.bfloat16):
    N, H, W, cin = x_nhwc.shape
    cout = p["w"].shape[0]
    w2d = p["w"][:, :, 0, 0].T.astype(jnp.bfloat16)           # (Cin, Cout)
    scale, shift = _bn_fold(p)
    M = N * H * W
    out_b = 2 if out_dtype == jnp.bfloat16 else 4
    TM, Mp = _pick_tm(M, cin * 2, cout * out_b, _TILE_BUDGET)
    x2d = x_nhwc.reshape(M, cin)
    if Mp != M:
        x2d = jnp.pad(x2d, ((0, Mp - M), (0, 0)))
    out = pl.pallas_call(
        _conv1x1_bn_silu_kernel,
        out_shape=jax.ShapeDtypeStruct((Mp, cout), out_dtype),
        grid=(Mp // TM,),
        in_specs=[
            pl.BlockSpec((TM, cin), lambda i: (i, 0)),
            pl.BlockSpec((cin, cout), lambda i: (0, 0)),
            pl.BlockSpec((1, cout), lambda i: (0, 0)),
            pl.BlockSpec((1, cout), lambda i: (0, 0)),
        ],
        out_specs=pl.BlockSpec((TM, cout), lambda i: (i, 0)),
        compiler_params=pltpu.CompilerParams(
            dimension_semantics=("parallel",),
            vmem_limit_bytes=_VMEM_LIMIT),
    )(x2d, w2d, scale, shift)
    if Mp != M:
        out = out[:M]
    return out.reshape(N, H, W, cout)


def bottleneck_fused(x_nhwc, bp):
    N, H, W, ch = x_nhwc.shape
    cb = bp["cv1"]["w"].shape[0]                              # hidden // 2
    w1 = bp["cv1"]["w"][:, :, 0, 0].T.astype(jnp.bfloat16)    # (Ch, Cb)
    s1, b1 = _bn_fold(bp["cv1"])
    w2 = jnp.transpose(bp["cv2"]["w"], (2, 3, 1, 0)).reshape(
        9 * cb, ch).astype(jnp.bfloat16)                      # (9*Cb, Ch)
    s2, b2 = _bn_fold(bp["cv2"])

    TH = _pick_th(H, W, ch, cb, N, _TILE_BUDGET)
    n_rt = H // TH

    c_spec = pl.BlockSpec((1, TH, W, ch), lambda n, r: (n, r, 0, 0))
    # 1-row halos above / below the tile, clamped at the image borders (the
    # clamped duplicate rows are zeroed again inside the kernel).
    t_spec = pl.BlockSpec((1, 1, W, ch),
                          lambda n, r: (n, jnp.maximum(r * TH - 1, 0), 0, 0))
    b_spec = pl.BlockSpec((1, 1, W, ch),
                          lambda n, r: (n, jnp.minimum((r + 1) * TH, H - 1), 0, 0))

    def const(shape):
        return pl.BlockSpec(shape, lambda n, r: (0, 0))

    out = pl.pallas_call(
        _bottleneck_kernel,
        out_shape=jax.ShapeDtypeStruct((N, H, W, ch), jnp.bfloat16),
        grid=(N, n_rt),
        in_specs=[
            c_spec, t_spec, b_spec,
            const((ch, cb)), const((1, cb)), const((1, cb)),
            const((9 * cb, ch)), const((1, ch)), const((1, ch)),
        ],
        out_specs=pl.BlockSpec((1, TH, W, ch), lambda n, r: (n, r, 0, 0)),
        scratch_shapes=[pltpu.VMEM((TH + 2, W + 2, cb), jnp.float32)],
        compiler_params=pltpu.CompilerParams(
            dimension_semantics=("parallel", "parallel"),
            vmem_limit_bytes=_VMEM_LIMIT),
    )(x_nhwc, x_nhwc, x_nhwc, w1, s1, b1, w2, s2, b2)
    return out


def cv2_branch_sum(branches, p, out_dtype=jnp.float32):
    n_br = len(branches)
    N, H, W, ch = branches[0].shape
    cout = p["w"].shape[0]
    w_full = p["w"][:, :, 0, 0].T.astype(jnp.bfloat16)        # (n_br*Ch, Cout)
    w_parts = [w_full[i * ch:(i + 1) * ch, :] for i in range(n_br)]
    scale, shift = _bn_fold(p)
    M = N * H * W
    out_b = 2 if out_dtype == jnp.bfloat16 else 4
    TM, Mp = _pick_tm(M, n_br * ch * 2, cout * out_b, _TILE_BUDGET)
    flats = [b.reshape(M, ch) for b in branches]
    if Mp != M:
        flats = [jnp.pad(f, ((0, Mp - M), (0, 0))) for f in flats]
    in_specs = [pl.BlockSpec((TM, ch), lambda i: (i, 0)) for _ in range(n_br)]
    in_specs += [pl.BlockSpec((ch, cout), lambda i: (0, 0)) for _ in range(n_br)]
    in_specs += [pl.BlockSpec((1, cout), lambda i: (0, 0)),
                 pl.BlockSpec((1, cout), lambda i: (0, 0))]
    out = pl.pallas_call(
        _make_cv2_kernel(n_br),
        out_shape=jax.ShapeDtypeStruct((Mp, cout), out_dtype),
        grid=(Mp // TM,),
        in_specs=in_specs,
        out_specs=pl.BlockSpec((TM, cout), lambda i: (i, 0)),
        compiler_params=pltpu.CompilerParams(
            dimension_semantics=("parallel",),
            vmem_limit_bytes=_VMEM_LIMIT),
    )(*flats, *w_parts, scale, shift)
    if Mp != M:
        out = out[:M]
    return out.reshape(N, H, W, cout)


def c2f_forward(x_nchw, params):
    # NCHW -> NHWC; activation chain is stored in bf16 between kernels.
    x = jnp.transpose(x_nchw, (0, 2, 3, 1)).astype(jnp.bfloat16)
    y = [conv1x1_bn_silu(x, params["cv1"], out_dtype=jnp.bfloat16)]
    for bp in params["bottlenecks"]:
        y.append(bottleneck_fused(y[-1], bp))
    out = cv2_branch_sum(y, params["cv2"], out_dtype=jnp.float32)
    return jnp.transpose(out, (0, 3, 1, 2))                  # NHWC -> NCHW


# ---------------------------------------------------------------------------
# Deterministic parameter init (synthetic; BN in eval mode with its own stats)
# ---------------------------------------------------------------------------
def init_conv(key, cin, cout, k):
    k1, k2, k3, k4, k5 = jax.random.split(key, 5)
    return {
        "w": jax.random.normal(k1, (cout, cin, k, k), jnp.float32)
        / float((cin * k * k) ** 0.5),
        "gamma": 1.0 + 0.1 * jax.random.normal(k2, (cout,), jnp.float32),
        "beta": 0.1 * jax.random.normal(k3, (cout,), jnp.float32),
        "mean": 0.1 * jax.random.normal(k4, (cout,), jnp.float32),
        "var": jnp.abs(jax.random.normal(k5, (cout,), jnp.float32)) + 0.5,
    }


def init_c2f(key, cin, cout, n):
    hidden = cout // 2
    keys = jax.random.split(key, 2 + 2 * n)
    params = {
        "cv1": init_conv(keys[0], cin, hidden, 1),
        "cv2": init_conv(keys[1], hidden * (n + 1), cout, 1),
        "bottlenecks": [],
    }
    hb = hidden // 2
    for i in range(n):
        params["bottlenecks"].append({
            "cv1": init_conv(keys[2 + 2 * i], hidden, hb, 1),
            "cv2": init_conv(keys[3 + 2 * i], hb, hidden, 3),
        })
    return params


# ---------------------------------------------------------------------------
# Pure-JAX reference (for correctness check only)
# ---------------------------------------------------------------------------
def _ref_conv(x_nchw, p, pad):
    y = jax.lax.conv_general_dilated(
        x_nchw, p["w"], (1, 1), [(pad, pad), (pad, pad)],
        dimension_numbers=("NCHW", "OIHW", "NCHW"))
    scale = p["gamma"] / jnp.sqrt(p["var"] + EPS)
    shift = p["beta"] - p["mean"] * scale
    y = y * scale[None, :, None, None] + shift[None, :, None, None]
    return y * jax.nn.sigmoid(y)


def c2f_reference(x_nchw, params):
    y = [_ref_conv(x_nchw, params["cv1"], 0)]
    for bp in params["bottlenecks"]:
        prev = y[-1]
        h = _ref_conv(prev, bp["cv1"], 0)
        y.append(prev + _ref_conv(h, bp["cv2"], 1))
    cat = jnp.concatenate(y, axis=1)
    return _ref_conv(cat, params["cv2"], 0)


# ---------------------------------------------------------------------------
if __name__ == "__main__":
    in_channels, out_channels, num_bottlenecks = 4, 8, 2
    N, H, W = 2, 16, 16

    key = jax.random.PRNGKey(0)
    kx, kp = jax.random.split(key)
    x = jax.random.normal(kx, (N, in_channels, H, W), jnp.float32)
    params = init_c2f(kp, in_channels, out_channels, num_bottlenecks)

    out = c2f_forward(x, params)
    out = jax.block_until_ready(out)

    ref = c2f_reference(x, params)
    if out.shape != (N, out_channels, H, W):
        raise AssertionError(f"bad output shape {out.shape}")
    max_err = float(jnp.max(jnp.abs(out - ref)))
    if not bool(jnp.allclose(out, ref, rtol=5e-2, atol=5e-2)):
        raise AssertionError(f"mismatch vs reference, max_err={max_err}")

    print("KERNEL_OK")
</pallas_src>

<mosaic_0001>
module attributes {stable_mosaic.version = 11 : i64} {
  func.func @_conv1x1_bn_silu_kernel(%arg0: i32, %arg1: memref<512x4xbf16, #tpu.memory_space<vmem>>, %arg2: memref<4x4xbf16, #tpu.memory_space<vmem>>, %arg3: memref<1x4xf32, #tpu.memory_space<vmem>>, %arg4: memref<1x4xf32, #tpu.memory_space<vmem>>, %arg5: memref<512x4xbf16, #tpu.memory_space<vmem>>) attributes {dimension_semantics = [#tpu.dimension_semantics<parallel>], iteration_bounds = array<i64: 1>, scalar_prefetch = 0 : i64, scratch_operands = 0 : i64, tpu.core_type = #tpu.core_type<tc>, window_params = [{transform_indices = @transform_0, window_bounds = array<i64: 512, 4>}, {pipeline_mode = #tpu.pipeline_mode<synchronous>, transform_indices = @transform_1, window_bounds = array<i64: 4, 4>}, {pipeline_mode = #tpu.pipeline_mode<synchronous>, transform_indices = @transform_2, window_bounds = array<i64: 1, 4>}, {pipeline_mode = #tpu.pipeline_mode<synchronous>, transform_indices = @transform_3, window_bounds = array<i64: 1, 4>}, {transform_indices = @transform_4, window_bounds = array<i64: 512, 4>}]} {
    %c0 = arith.constant 0 : index
    %c0_0 = arith.constant 0 : index
    %0 = vector.load %arg1[%c0, %c0_0] : memref<512x4xbf16, #tpu.memory_space<vmem>>, vector<512x4xbf16>
    %c0_1 = arith.constant 0 : index
    %c0_2 = arith.constant 0 : index
    %1 = vector.load %arg2[%c0_1, %c0_2] : memref<4x4xbf16, #tpu.memory_space<vmem>>, vector<4x4xbf16>
    %cst = arith.constant dense<0.000000e+00> : vector<512x4xf32>
    %2 = tpu.matmul %0, %1, %cst {dimension_numbers = #tpu.dot_dimension_numbers<[1], [0], [0], [1], [0, 0, 1, 1], [], []>} : vector<512x4xbf16>, vector<4x4xbf16>, vector<512x4xf32> -> vector<512x4xf32>
    %c0_3 = arith.constant 0 : index
    %c0_4 = arith.constant 0 : index
    %3 = vector.load %arg3[%c0_3, %c0_4] : memref<1x4xf32, #tpu.memory_space<vmem>>, vector<1x4xf32>
    %4 = vector.broadcast %3 : vector<1x4xf32> to vector<512x4xf32>
    %5 = arith.mulf %2, %4 : vector<512x4xf32>
    %c0_5 = arith.constant 0 : index
    %c0_6 = arith.constant 0 : index
    %6 = vector.load %arg4[%c0_5, %c0_6] : memref<1x4xf32, #tpu.memory_space<vmem>>, vector<1x4xf32>
    %7 = vector.broadcast %6 : vector<1x4xf32> to vector<512x4xf32>
    %8 = arith.addf %5, %7 : vector<512x4xf32>
    %cst_7 = arith.constant 0.000000e+00 : f32
    %9 = vector.broadcast %cst_7 : f32 to vector<512x4xf32>
    %10 = arith.subf %9, %8 : vector<512x4xf32>
    %11 = math.exp %10 : vector<512x4xf32>
    %cst_8 = arith.constant 1.000000e+00 : f32
    %12 = vector.broadcast %cst_8 : f32 to vector<512x4xf32>
    %13 = arith.addf %12, %11 : vector<512x4xf32>
    %14 = tpu.reciprocal %13 {approx = true} : vector<512x4xf32> -> vector<512x4xf32>
    %15 = arith.mulf %8, %14 : vector<512x4xf32>
    %16 = arith.truncf %15 : vector<512x4xf32> to vector<512x4xbf16>
    %c0_9 = arith.constant 0 : index
    %c0_10 = arith.constant 0 : index
    %17 = vector.load %arg5[%c0_9, %c0_10] : memref<512x4xbf16, #tpu.memory_space<vmem>>, vector<512x4xbf16>
    tpu.vector_store %arg5[%c0_9, %c0_10], %16 {strides = array<i32>} : memref<512x4xbf16, #tpu.memory_space<vmem>>, vector<512x4xbf16>,
    return
  }
  func.func @transform_0(%arg0: i32) -> (i32, i32) {
    %c0_i32 = arith.constant 0 : i32
    %c0_i32_0 = arith.constant 0 : i32
    return %arg0, %c0_i32 : i32, i32
  }
  func.func @transform_1(%arg0: i32) -> (i32, i32) {
    %c0_i32 = arith.constant 0 : i32
    %c0_i32_0 = arith.constant 0 : i32
    %c0_i32_1 = arith.constant 0 : i32
    return %c0_i32, %c0_i32_0 : i32, i32
  }
  func.func @transform_2(%arg0: i32) -> (i32, i32) {
    %c0_i32 = arith.constant 0 : i32
    %c0_i32_0 = arith.constant 0 : i32
    %c0_i32_1 = arith.constant 0 : i32
    return %c0_i32, %c0_i32_0 : i32, i32
  }
  func.func @transform_3(%arg0: i32) -> (i32, i32) {
    %c0_i32 = arith.constant 0 : i32
    %c0_i32_0 = arith.constant 0 : i32
    %c0_i32_1 = arith.constant 0 : i32
    return %c0_i32, %c0_i32_0 : i32, i32
  }
  func.func @transform_4(%arg0: i32) -> (i32, i32) {
    %c0_i32 = arith.constant 0 : i32
    %c0_i32_0 = arith.constant 0 : i32
    return %arg0, %c0_i32 : i32, i32
  }
}

</mosaic_0001>

<bundles_post_ra>
// kernel: tpu_custom_call.1
= control target key start
LH: loop header
LB: loop body
LE: loop exit
PB: predicated region body
PF: predicated region fallthrough
CT: control target
= control target key end

     0   :  { %vm340_vm0 = vcmask 1041408   ;;  %vm243_vm1 = vcmask 31744   ;;  %vm1415_vm2 = vcmask 27648   ;;  %s3031_s1 = inlined_call_operand.vmem [shape: bf16[4,4], index: 1, kind: input, shape index: {}]   ;;  %s3032_s0 = inlined_call_operand.vmem [shape: bf16[512,4], index: 0, kind: input, shape index: {}]   ;;  %s3033_s2 = inlined_call_operand.vmem [shape: f32[1,4], index: 2, kind: input, shape index: {}]   ;;  %s3034_s3 = inlined_call_operand.vmem [shape: f32[1,4], index: 3, kind: input, shape index: {}]   ;;  %s3035_s4 = inlined_call_operand.vmem [shape: bf16[512,4], index: 4, kind: output, shape index: {}]  }
   0x1   :  { %v82_v0 = vld [vmem:[%s3031_s1] sm:$0x3]  ;;  %v1783_v4 = vld [vmem:[%s3032_s0 + $0x8] sm:$0xff]   ;;  %v1785_v6 = vld [vmem:[%s3032_s0 + $0x10] sm:$0xff]  }
   0x2   :  { %1779 = vmatprep.subr.msk.bf16.mxu0 %vm340_vm0, %v82_v0  ;;  %1780 = vmatprep.subr.msk.bf16.mxu1 %vm340_vm0, %v82_v0  ;;  %v342_v1 = vsel %vm340_vm0, %v82_v0, 0  ;;  %v1781_v2 = vld [vmem:[%s3032_s0] sm:$0xff]   ;;  %v1784_v5 = vld [vmem:[%s3032_s0 + $0x88] sm:$0xff]   ;;  %v1786_v7 = vld [vmem:[%s3032_s0 + $0x90] sm:$0xff]  }
   0x3   :  { %1712 = vmatpush3.bf16.msra.mxu0 %v342_v1  ;;  %1778 = vmatpush3.bf16.msra.mxu1 %v342_v1  ;;  %v1782_v3 = vld [vmem:[%s3032_s0 + $0x80] sm:$0xff]   ;;  %v1787_v8 = vld [vmem:[%s3032_s0 + $0x18] sm:$0xff]   ;;  %v1791_v12 = vld [vmem:[%s3032_s0 + $0x28] sm:$0xff]  }
   0x4   :  { %1713 = vmatprep.mubr.msk.bf16.mxu0 %vm243_vm1, %v1781_v2  ;;  %1745 = vmatprep.mubr.msk.bf16.mxu1 %vm243_vm1, %v1782_v3  ;;  %v1788_v9 = vld [vmem:[%s3032_s0 + $0x98] sm:$0xff]   ;;  %v1789_v10 = vld [vmem:[%s3032_s0 + $0x20] sm:$0xff]   ;;  %v1792_v13 = vld [vmem:[%s3032_s0 + $0xa8] sm:$0xff]  }
   0x5   :  { %v1790_v11 = vld [vmem:[%s3032_s0 + $0xa0] sm:$0xff]   ;;  %v1793_v14 = vld [vmem:[%s3032_s0 + $0x30] sm:$0xff]   ;;  %v1795_v16 = vld [vmem:[%s3032_s0 + $0x38] sm:$0xff]  }
   0x6   :  { %1714 = vmatmul.mubr.msk.bf16.vlgmr.msra.gmra.mrb[0].mxu0 %vm243_vm1, %v1783_v4  ;;  %1746 = vmatmul.mubr.msk.bf16.vlgmr.msra.gmra.mrb[0].mxu1 %vm243_vm1, %v1784_v5  ;;  %v1794_v15 = vld [vmem:[%s3032_s0 + $0xb0] sm:$0xff]   ;;  %v1796_v17 = vld [vmem:[%s3032_s0 + $0xb8] sm:$0xff]   ;;  %v1797_v18 = vld [vmem:[%s3032_s0 + $0x40] sm:$0xff]  }
   0x7   :  { %1717 = vmatprep.mubr.msk.bf16.mxu0 %vm243_vm1, %v1785_v6  ;;  %1749 = vmatprep.mubr.msk.bf16.mxu1 %vm243_vm1, %v1786_v7  ;;  %v1798_v19 = vld [vmem:[%s3032_s0 + $0xc0] sm:$0xff]   ;;  %v1799_v20 = vld [vmem:[%s3032_s0 + $0x48] sm:$0xff]   ;;  %v1801_v22 = vld [vmem:[%s3032_s0 + $0x50] sm:$0xff]  }
   0x8   :  { %v1800_v21 = vld [vmem:[%s3032_s0 + $0xc8] sm:$0xff]   ;;  %v1802_v23 = vld [vmem:[%s3032_s0 + $0xd0] sm:$0xff]   ;;  %v1803_v24 = vld [vmem:[%s3032_s0 + $0x58] sm:$0xff]  }
   0x9   :  { %v1804_v25 = vld [vmem:[%s3032_s0 + $0xd8] sm:$0xff]   ;;  %v1805_v26 = vld [vmem:[%s3032_s0 + $0x60] sm:$0xff]   ;;  %v1807_v28 = vld [vmem:[%s3032_s0 + $0x68] sm:$0xff]  }
   0xa   :  { %v1806_v27 = vld [vmem:[%s3032_s0 + $0xe0] sm:$0xff]   ;;  %v1808_v29 = vld [vmem:[%s3032_s0 + $0xe8] sm:$0xff]   ;;  %v1809_v30 = vld [vmem:[%s3032_s0 + $0x70] sm:$0xff]  }
   0xb   :  { %v1810_v31 = vld [vmem:[%s3032_s0 + $0xf0] sm:$0xff]   ;;  %v1811_v32 = vld [vmem:[%s3032_s0 + $0x78] sm:$0xff]   ;;  %v2230_v34 = vld [vmem:[%s3033_s2] ss:$0 sm:$0xff] }
   0xc   :  { %v1812_v33 = vld [vmem:[%s3032_s0 + $0xf8] sm:$0xff]   ;;  %v2235_v36 = vld [vmem:[%s3034_s3] ss:$0 sm:$0xff] }
   0xe   :  { %1718 = vmatmul.mubr.msk.bf16.gmra.mrb[4].mxu0 %vm243_vm1, %v1787_v8  ;;  %1750 = vmatmul.mubr.msk.bf16.gmra.mrb[4].mxu1 %vm243_vm1, %v1788_v9 }
   0xf   :  { %1721 = vmatprep.mubr.msk.bf16.mxu0 %vm243_vm1, %v1789_v10  ;;  %1753 = vmatprep.mubr.msk.bf16.mxu1 %vm243_vm1, %v1790_v11 }
  0x16   :  { %1722 = vmatmul.mubr.msk.bf16.gmra.mrb[8].mxu0 %vm243_vm1, %v1791_v12  ;;  %1754 = vmatmul.mubr.msk.bf16.gmra.mrb[8].mxu1 %vm243_vm1, %v1792_v13 }
  0x17   :  { %1725 = vmatprep.mubr.msk.bf16.mxu0 %vm243_vm1, %v1793_v14  ;;  %1757 = vmatprep.mubr.msk.bf16.mxu1 %vm243_vm1, %v1794_v15 }
  0x1e   :  { %1726 = vmatmul.mubr.msk.bf16.gmra.mrb[12].mxu0 %vm243_vm1, %v1795_v16  ;;  %1758 = vmatmul.mubr.msk.bf16.gmra.mrb[12].mxu1 %vm243_vm1, %v1796_v17 }
  0x1f   :  { %1729 = vmatprep.mubr.msk.bf16.mxu0 %vm243_vm1, %v1797_v18  ;;  %1761 = vmatprep.mubr.msk.bf16.mxu1 %vm243_vm1, %v1798_v19 }
  0x26   :  { %1730 = vmatmul.mubr.msk.bf16.gmra.mrb[16].mxu0 %vm243_vm1, %v1799_v20  ;;  %1762 = vmatmul.mubr.msk.bf16.gmra.mrb[16].mxu1 %vm243_vm1, %v1800_v21 }
  0x27   :  { %1733 = vmatprep.mubr.msk.bf16.mxu0 %vm243_vm1, %v1801_v22  ;;  %1765 = vmatprep.mubr.msk.bf16.mxu1 %vm243_vm1, %v1802_v23 }
  0x2e   :  { %1734 = vmatmul.mubr.msk.bf16.gmra.mrb[20].mxu0 %vm243_vm1, %v1803_v24  ;;  %1766 = vmatmul.mubr.msk.bf16.gmra.mrb[20].mxu1 %vm243_vm1, %v1804_v25 }
  0x2f   :  { %1737 = vmatprep.mubr.msk.bf16.mxu0 %vm243_vm1, %v1805_v26  ;;  %1769 = vmatprep.mubr.msk.bf16.mxu1 %vm243_vm1, %v1806_v27 }
  0x36   :  { %1738 = vmatmul.mubr.msk.bf16.gmra.mrb[24].mxu0 %vm243_vm1, %v1807_v28  ;;  %1770 = vmatmul.mubr.msk.bf16.gmra.mrb[24].mxu1 %vm243_vm1, %v1808_v29 }
  0x37   :  { %1741 = vmatprep.mubr.msk.bf16.mxu0 %vm243_vm1, %v1809_v30  ;;  %1773 = vmatprep.mubr.msk.bf16.mxu1 %vm243_vm1, %v1810_v31 }
  0x3e   :  { %1742 = vmatmul.mubr.msk.bf16.gmra.mrb[28].mxu0 %vm243_vm1, %v1811_v32  ;;  %1774 = vmatmul.mubr.msk.bf16.gmra.mrb[28].mxu1 %vm243_vm1, %v1812_v33 }
  0xd9   :  { %v1715_v35 = vpop.f32.mrb[0].mxu0  ;;  %v1747_v38 = vpop.f32.mrb[0].mxu1 }
  0xda   :  { %v642_v37 = vmul.f32 %v1715_v35, %v2230_v34  ;;  %v378_v39 = vpop.f32.mrb[1].mxu0  ;;  %v674_v40 = vmul.f32 %v1747_v38, %v2230_v34  ;;  %v506_v42 = vpop.f32.mrb[1].mxu1 }
  0xdb   :  { %v640_v41 = vmul.f32 %v2230_v34, %v378_v39  ;;  %v1716_v43 = vpop.f32.mrb[2].mxu0  ;;  %v672_v45 = vmul.f32 %v2230_v34, %v506_v42  ;;  %v1748_v47 = vpop.f32.mrb[2].mxu1 }
  0xdc   :  { %v2241_v44 = vadd.f32 %v2235_v36, %v642_v37  ;;  %v643_v46 = vmul.f32 %v1716_v43, %v2230_v34  ;;  %v381_v48 = vpop.f32.mrb[3].mxu0  ;;  %v2246_v49 = vadd.f32 %v2235_v36, %v674_v40  ;;  %v675_v51 = vmul.f32 %v1748_v47, %v2230_v34  ;;  %v509_v53 = vpop.f32.mrb[3].mxu1 }
  0xdd   :  { %v2249_v50 = vadd.f32 %v2235_v36, %v640_v41  ;;  %v641_v52 = vmul.f32 %v2230_v34, %v381_v48  ;;  %v2255_v55 = vadd.f32 %v2235_v36, %v672_v45  ;;  %v673_v57 = vmul.f32 %v2230_v34, %v509_v53 }
  0xde   :  { %v777_v54 = vsub.f32 0.0, %v2241_v44  ;;  %v2258_v56 = vadd.f32 %v2235_v36, %v643_v46  ;;  %v809_v58 = vsub.f32 0.0, %v2246_v49  ;;  %v2264_v60 = vadd.f32 %v2235_v36, %v675_v51 }
  0xdf   :  { %v775_v59 = vsub.f32 0.0, %v2249_v50  ;;  %v2267_v61 = vadd.f32 %v2235_v36, %v641_v52  ;;  %v807_v63 = vsub.f32 0.0, %v2255_v55  ;;  %v2272_v1 = vadd.f32 %v2235_v36, %v673_v57 }
  0xe0   :  { %v843_v62 = vmul.f32 1.442695, %v777_v54  ;;  %v778_v0 = vsub.f32 0.0, %v2258_v56  ;;  %v907_v2 = vmul.f32 1.442695, %v809_v58  ;;  %v810_v4 = vsub.f32 0.0, %v2264_v60 }
  0xe1   :  { %v839_v3 = vmul.f32 1.442695, %v775_v59  ;;  %v776_v5 = vsub.f32 0.0, %v2267_v61  ;;  %v903_v6 = vmul.f32 1.442695, %v807_v63  ;;  %v808_v8 = vsub.f32 0.0, %v2272_v1 }
  0xe2   :  { %1813 = vpow2.f32 %v843_v62  ;;  %v845_v7 = vmul.f32 1.442695, %v778_v0  ;;  %v1719_v9 = vpop.f32.mrb[4].mxu0  ;;  %v909_v10 = vmul.f32 1.442695, %v810_v4  ;;  %v1751_v13 = vpop.f32.mrb[4].mxu1 }
  0xe3   :  { %1815 = vpow2.f32 %v907_v2  ;;  %v841_v11 = vmul.f32 1.442695, %v776_v5  ;;  %v646_v12 = vmul.f32 %v1719_v9, %v2230_v34  ;;  %v394_v14 = vpop.f32.mrb[5].mxu0  ;;  %v905_v15 = vmul.f32 1.442695, %v808_v8  ;;  %v522_v18 = vpop.f32.mrb[5].mxu1 }
  0xe4   :  { %1817 = vpow2.f32 %v839_v3  ;;  %v678_v16 = vmul.f32 %v1751_v13, %v2230_v34  ;;  %v644_v17 = vmul.f32 %v2230_v34, %v394_v14  ;;  %v1720_v19 = vpop.f32.mrb[6].mxu0  ;;  %v676_v21 = vmul.f32 %v2230_v34, %v522_v18  ;;  %v1752_v23 = vpop.f32.mrb[6].mxu1 }
  0xe5   :  { %1819 = vpow2.f32 %v903_v6  ;;  %v2281_v20 = vadd.f32 %v2235_v36, %v646_v12  ;;  %v647_v22 = vmul.f32 %v1720_v19, %v2230_v34  ;;  %v397_v24 = vpop.f32.mrb[7].mxu0  ;;  %v679_v27 = vmul.f32 %v1752_v23, %v2230_v34  ;;  %v525_v28 = vpop.f32.mrb[7].mxu1 }
  0xe6   :  { %1821 = vpow2.f32 %v845_v7  ;;  %v2286_v25 = vadd.f32 %v2235_v36, %v678_v16  ;;  %v2289_v26 = vadd.f32 %v2235_v36, %v644_v17  ;;  %v2294_v30 = vadd.f32 %v2235_v36, %v676_v21 }
  0xe7   :  { %1823 = vpow2.f32 %v909_v10  ;;  %v781_v29 = vsub.f32 0.0, %v2281_v20  ;;  %v2297_v31 = vadd.f32 %v2235_v36, %v647_v22  ;;  %v2302_v35 = vadd.f32 %v2235_v36, %v679_v27 }
  0xe8   :  { %1825 = vpow2.f32 %v841_v11  ;;  %v813_v32 = vsub.f32 0.0, %v2286_v25  ;;  %v779_v33 = vsub.f32 0.0, %v2289_v26  ;;  %v811_v38 = vsub.f32 0.0, %v2294_v30 }
  0xe9   :  { %1827 = vpow2.f32 %v905_v15  ;;  %v851_v37 = vmul.f32 1.442695, %v781_v29  ;;  %v782_v39 = vsub.f32 0.0, %v2297_v31  ;;  %v1723_v40 = vpop.f32.mrb[8].mxu0  ;;  %v814_v43 = vsub.f32 0.0, %v2302_v35  ;;  %v1755_v46 = vpop.f32.mrb[8].mxu1 }
  0xea   :  { %v915_v41 = vmul.f32 1.442695, %v813_v32  ;;  %v847_v42 = vmul.f32 1.442695, %v779_v33  ;;  %v645_v45 = vmul.f32 %v2230_v34, %v397_v24  ;;  %v911_v47 = vmul.f32 1.442695, %v811_v38 }
  0xeb   :  { %1829 = vpow2.f32 %v851_v37  ;;  %v2308_v48 = vmul.f32 1.442695, %v782_v39  ;;  %v677_v51 = vmul.f32 %v2230_v34, %v525_v28  ;;  %v410_v52 = vpop.f32.mrb[9].mxu0  ;;  %v538_v53 = vpop.f32.mrb[9].mxu1  ;;  %v2311_v57 = vmul.f32 1.442695, %v814_v43 }
  0xec   :  { %v1814_v54 = vpop.eup %1813  ;;  %1831 = vpow2.f32 %v915_v41  ;;  %v2314_v58 = vadd.f32 %v2235_v36, %v645_v45  ;;  %v650_v59 = vmul.f32 %v1723_v40, %v2230_v34  ;;  %v1724_v62 = vpop.f32.mrb[10].mxu0  ;;  %v682_v4 = vmul.f32 %v1755_v46, %v2230_v34 }
  0xed   :  { %v1756_v63 = vpop.f32.mrb[10].mxu1  ;;  %v1816_v0 = vpop.eup %1815  ;;  %v969_v2 = vadd.f32 1.0, %v1814_v54  ;;  %1833 = vpow2.f32 %v847_v42  ;;  %v2318_v3 = vadd.f32 %v2235_v36, %v677_v51  ;;  %v648_v32 = vmul.f32 %v2230_v34, %v410_v52 }
  0xee   :  { %v413_v5 = vpop.f32.mrb[11].mxu0  ;;  %v2321_v6 = vpop.f32.mrb[11].mxu1  ;;  %v1001_v8 = vadd.f32 1.0, %v1816_v0  ;;  %1835 = vpow2.f32 %v911_v47  ;;  %v780_v9 = vsub.f32 0.0, %v2314_v58  ;;  %v2325_v10 = vadd.f32 %v2235_v36, %v650_v59 }
  0xef   :  { %v1818_v7 = vpop.eup %1817  ;;  %1837 = vrcp.f32 %v969_v2  ;;  %v812_v13 = vsub.f32 0.0, %v2318_v3  ;;  %v2329_v14 = vadd.f32 %v2235_v36, %v682_v4  ;;  %v680_v41 = vmul.f32 %v2230_v34, %v538_v53 }
  0xf0   :  { %v1820_v11 = vpop.eup %1819  ;;  %v967_v12 = vadd.f32 1.0, %v1818_v7  ;;  %1839 = vrcp.f32 %v1001_v8  ;;  %v2331_v17 = vmul.f32 1.442695, %v780_v9  ;;  %v785_v18 = vsub.f32 0.0, %v2325_v10 }
  0xf1   :  { %v1822_v15 = vpop.eup %1821  ;;  %v999_v16 = vadd.f32 1.0, %v1820_v11  ;;  %v2334_v22 = vmul.f32 1.442695, %v812_v13  ;;  %v817_v23 = vsub.f32 0.0, %v2329_v14  ;;  %v2337_v24 = vpop.f32.mrb[12].mxu0  ;;  %v2354_v46 = vadd.f32 %v2235_v36, %v648_v32 }
  0xf2   :  { %v1824_v19 = vpop.eup %1823  ;;  %1841 = vrcp.f32 %v967_v12  ;;  %v970_v21 = vadd.f32 1.0, %v1822_v15  ;;  %v2339_v29 = vmul.f32 1.442695, %v785_v18  ;;  %v2342_v33 = vpop.f32.mrb[12].mxu1  ;;  %v651_v47 = vmul.f32 %v1724_v62, %v2230_v34 }
  0xf3   :  { %v1826_v27 = vpop.eup %1825  ;;  %1843 = vrcp.f32 %v999_v16  ;;  %v1002_v28 = vadd.f32 1.0, %v1824_v19  ;;  %v2344_v37 = vpop.f32.mrb[13].mxu0  ;;  %v2346_v40 = vmul.f32 1.442695, %v817_v23  ;;  %v2362_v59 = vadd.f32 %v2235_v36, %v680_v41 }
  0xf4   :  { %v1828_v38 = vpop.eup %1827  ;;  %1845 = vrcp.f32 %v970_v21  ;;  %v968_v39 = vadd.f32 1.0, %v1826_v27  ;;  %v2349_v42 = vpop.f32.mrb[13].mxu1  ;;  %v683_v53 = vmul.f32 %v1756_v63, %v2230_v34  ;;  %v649_v0 = vmul.f32 %v2230_v34, %v413_v5 }
  0xf5   :  { %v2351_v43 = vpop.f32.mrb[14].mxu0  ;;  %1847 = vrcp.f32 %v1002_v28  ;;  %v1000_v45 = vadd.f32 1.0, %v1828_v38  ;;  %v2357_v51 = vpop.f32.mrb[14].mxu1  ;;  %v783_v62 = vsub.f32 0.0, %v2354_v46  ;;  %v2370_v8 = vadd.f32 %v2235_v36, %v651_v47 }
  0xf6   :  { %v2359_v52 = vpop.f32.mrb[15].mxu0  ;;  %v1830_v54 = vpop.eup %1829  ;;  %1849 = vrcp.f32 %v968_v39  ;;  %v815_v12 = vsub.f32 0.0, %v2362_v59  ;;  %v2375_v63 = vadd.f32 %v2235_v36, %v683_v53  ;;  %v2383_v38 = vadd.f32 %v2235_v36, %v649_v0 }
  0xf7   :  { %v2366_v2 = vpop.f32.mrb[15].mxu1  ;;  %v1832_v4 = vpop.eup %1831  ;;  %1851 = vrcp.f32 %v1000_v45  ;;  %v973_v7 = vadd.f32 1.0, %v1830_v54  ;;  %v855_v15 = vmul.f32 1.442695, %v783_v62  ;;  %v786_v16 = vsub.f32 0.0, %v2370_v8 }
  0xf8   :  { %v1834_v9 = vpop.eup %1833  ;;  %v1005_v11 = vadd.f32 1.0, %v1832_v4  ;;  %1853 = vpow2.f32 %v2308_v48  ;;  %v919_v21 = vmul.f32 1.442695, %v815_v12  ;;  %v818_v23 = vsub.f32 0.0, %v2375_v63 }
  0xf9   :  { %v1836_v5 = vpop.eup %1835  ;;  %1855 = vrcp.f32 %v973_v7  ;;  %v971_v13 = vadd.f32 1.0, %v1834_v9  ;;  %v2379_v27 = vpop.f32.mrb[16].mxu0  ;;  %v861_v32 = vmul.f32 1.442695, %v786_v16  ;;  %v681_v53 = vmul.f32 %v2230_v34, %v2321_v6 }
  0xfa   :  { %v1838_v18 = vpop.eup %1837  ;;  %1857 = vrcp.f32 %v1005_v11  ;;  %v1003_v19 = vadd.f32 1.0, %v1836_v5  ;;  %v2385_v39 = vpop.f32.mrb[16].mxu1  ;;  %v2390_v54 = vmul.f32 1.442695, %v818_v23  ;;  %v784_v9 = vsub.f32 0.0, %v2383_v38 }
  0xfb   :  { %v1840_v48 = vpop.eup %1839  ;;  %v1097_v28 = vmul.f32 %v1838_v18, %v2241_v44  ;;  %1859 = vrcp.f32 %v971_v13  ;;  %v2387_v41 = vpop.f32.mrb[17].mxu0  ;;  %v2408_v13 = vadd.f32 %v2235_v36, %v681_v53 }
  0xfc   :  { %v1842_v45 = vpop.eup %1841  ;;  %v1129_v47 = vmul.f32 %v1840_v48, %v2246_v49  ;;  %1861 = vrcp.f32 %v1003_v19  ;;  %v2394_v4 = vpop.f32.mrb[17].mxu1  ;;  %v857_v19 = vmul.f32 1.442695, %v784_v9 }
  0xfd   :  { %v2396_v44 = vpop.f32.mrb[18].mxu0  ;;  %v1844_v7 = vpop.eup %1843  ;;  %v1616_v0 = vpack.c.bf16 %v1097_v28, %v1097_v28  ;;  %v1095_v62 = vmul.f32 %v1842_v45, %v2249_v50  ;;  %1863 = vpow2.f32 %v2311_v57  ;;  %v816_v48 = vsub.f32 0.0, %v2408_v13 }
  0xfe   :  { %v2401_v11 = vpop.f32.mrb[18].mxu1  ;;  %v2403_v49 = vpop.f32.mrb[19].mxu0  ;;  %v1648_v5 = vpack.c.bf16 %v1129_v47, %v1129_v47  ;;  %v1127_v6 = vmul.f32 %v1844_v7, %v2255_v55  ;;  %1865 = vpow2.f32 %v2331_v17  ;;  %v654_v45 = vmul.f32 %v2337_v24, %v2230_v34 }
  0xff   :  { %v1846_v12 = vpop.eup %1845  ;;  %v2410_v16 = vpop.f32.mrb[19].mxu1  ;;  %1418 = vst.msk [vmem:[%s3035_s4 + $0x8] sm:$0xf] %vm1415_vm2, %v1616_v0  ;;  %v1614_v57 = vpack.c.bf16 %v1095_v62, %v1095_v62  ;;  %1867 = vpow2.f32 %v2334_v22  ;;  %v921_v53 = vmul.f32 1.442695, %v816_v48 }
 0x100   :  { %v1848_v50 = vpop.eup %1847  ;;  %v1098_v18 = vmul.f32 %v1846_v12, %v2258_v56  ;;  %1450 = vst.msk [vmem:[%s3035_s4 + $0x88] sm:$0xf] %vm1415_vm2, %v1648_v5  ;;  %v1646_v17 = vpack.c.bf16 %v1127_v6, %v1127_v6  ;;  %1869 = vpow2.f32 %v2339_v29 }
 0x101   :  { %v1850_v55 = vpop.eup %1849  ;;  %v1130_v23 = vmul.f32 %v1848_v50, %v2264_v60  ;;  %1416 = vst.msk [vmem:[%s3035_s4] sm:$0xf] %vm1415_vm2, %v1614_v57  ;;  %1871 = vpow2.f32 %v2346_v40  ;;  %v2438_v7 = vpop.f32.mrb[20].mxu0  ;;  %v2445_v40 = vadd.f32 %v2235_v36, %v654_v45 }
 0x102   :  { %v1852_v28 = vpop.eup %1851  ;;  %v1617_v56 = vpack.c.bf16 %v1098_v18, %v1098_v18  ;;  %v1096_v22 = vmul.f32 %v1850_v55, %v2267_v61  ;;  %1448 = vst.msk [vmem:[%s3035_s4 + $0x80] sm:$0xf] %vm1415_vm2, %v1646_v17  ;;  %1873 = vpow2.f32 %v855_v15  ;;  %v2447_v62 = vpop.f32.mrb[20].mxu1 }
 0x103   :  { %v1854_v47 = vpop.eup %1853  ;;  %v1649_v60 = vpack.c.bf16 %v1130_v23, %v1130_v23  ;;  %v1128_v29 = vmul.f32 %v1852_v28, %v2272_v1  ;;  %1875 = vpow2.f32 %v919_v21  ;;  %v2449_v9 = vpop.f32.mrb[21].mxu0  ;;  %v686_v21 = vmul.f32 %v2342_v33, %v2230_v34 }
 0x104   :  { %v1856_v0 = vpop.eup %1855  ;;  %1419 = vst.msk [vmem:[%s3035_s4 + $0xc] sm:$0xf] %vm1415_vm2, %v1617_v56  ;;  %v1615_v61 = vpack.c.bf16 %v1096_v22, %v1096_v22  ;;  %v974_v24 = vadd.f32 1.0, %v1854_v47  ;;  %1877 = vpow2.f32 %v861_v32  ;;  %v2458_v5 = vpop.f32.mrb[21].mxu1  ;;  %v789_v18 = vsub.f32 0.0, %v2445_v40 }
 0x105   :  { %v1858_v1 = vpop.eup %1857  ;;  %1451 = vst.msk [vmem:[%s3035_s4 + $0x8c] sm:$0xf] %vm1415_vm2, %v1649_v60  ;;  %v1647_v15 = vpack.c.bf16 %v1128_v29, %v1128_v29  ;;  %v1101_v12 = vmul.f32 %v1856_v0, %v2281_v20  ;;  %v2460_v6 = vpop.f32.mrb[22].mxu0  ;;  %v652_v20 = vmul.f32 %v2230_v34, %v2344_v37 }
 0x106   :  { %v1860_v50 = vpop.eup %1859  ;;  %1417 = vst.msk [vmem:[%s3035_s4 + $0x4] sm:$0xf] %vm1415_vm2, %v1615_v61  ;;  %v1133_v57 = vmul.f32 %v1858_v1, %v2286_v25  ;;  %1879 = vrcp.f32 %v974_v24  ;;  %v2470_v32 = vpop.f32.mrb[22].mxu1  ;;  %v2481_v25 = vadd.f32 %v2235_v36, %v686_v21  ;;  %v867_v22 = vmul.f32 1.442695, %v789_v18 }
 0x107   :  { %v2472_v33 = vpop.f32.mrb[23].mxu0  ;;  %v1862_v55 = vpop.eup %1861  ;;  %1449 = vst.msk [vmem:[%s3035_s4 + $0x84] sm:$0xf] %vm1415_vm2, %v1647_v15  ;;  %v1620_v17 = vpack.c.bf16 %v1101_v12, %v1101_v12  ;;  %v1099_v23 = vmul.f32 %v1860_v50, %v2289_v26  ;;  %1881 = vpow2.f32 %v2390_v54  ;;  %v2496_v29 = vadd.f32 %v2235_v36, %v652_v20 }
 0x108   :  { %v2483_v48 = vpop.f32.mrb[23].mxu1  ;;  %v1864_v37 = vpop.eup %1863  ;;  %v1652_v28 = vpack.c.bf16 %v1133_v57, %v1133_v57  ;;  %v1131_v56 = vmul.f32 %v1862_v55, %v2294_v30  ;;  %1883 = vpow2.f32 %v857_v19  ;;  %v821_v54 = vsub.f32 0.0, %v2481_v25 }
 0x109   :  { %v1866_v45 = vpop.eup %1865  ;;  %1422 = vst.msk [vmem:[%s3035_s4 + $0x18] sm:$0xf] %vm1415_vm2, %v1620_v17  ;;  %v1618_v26 = vpack.c.bf16 %v1099_v23, %v1099_v23  ;;  %v1006_v47 = vadd.f32 1.0, %v1864_v37  ;;  %1885 = vpow2.f32 %v921_v53  ;;  %v684_v24 = vmul.f32 %v2230_v34, %v2349_v42  ;;  %v2504_v1 = vpop.f32.mrb[24].mxu0 }
 0x10a   :  { %v1868_v60 = vpop.eup %1867  ;;  %1454 = vst.msk [vmem:[%s3035_s4 + $0x98] sm:$0xf] %vm1415_vm2, %v1652_v28  ;;  %v1650_v30 = vpack.c.bf16 %v1131_v56, %v1131_v56  ;;  %v972_v19 = vadd.f32 1.0, %v1866_v45  ;;  %1887 = vpow2.f32 %v867_v22  ;;  %v931_v61 = vmul.f32 1.442695, %v821_v54  ;;  %v2513_v57 = vpop.f32.mrb[24].mxu1 }
 0x10b   :  { %v1870_v0 = vpop.eup %1869  ;;  %1420 = vst.msk [vmem:[%s3035_s4 + $0x10] sm:$0xf] %vm1415_vm2, %v1618_v26  ;;  %1889 = vrcp.f32 %v1006_v47  ;;  %v1004_v53 = vadd.f32 1.0, %v1868_v60  ;;  %v787_v21 = vsub.f32 0.0, %v2496_v29  ;;  %v655_v50 = vmul.f32 %v2351_v43, %v2230_v34  ;;  %v2515_v18 = vpop.f32.mrb[25].mxu0 }
 0x10c   :  { %v1872_v15 = vpop.eup %1871  ;;  %1452 = vst.msk [vmem:[%s3035_s4 + $0x90] sm:$0xf] %vm1415_vm2, %v1650_v30  ;;  %1891 = vrcp.f32 %v972_v19  ;;  %v977_v12 = vadd.f32 1.0, %v1870_v0  ;;  %v2518_v55 = vadd.f32 %v2235_v36, %v684_v24  ;;  %v687_v17 = vmul.f32 %v2357_v51, %v2230_v34  ;;  %v2522_v23 = vpop.f32.mrb[25].mxu1 }
 0x10d   :  { %v1874_v42 = vpop.eup %1873  ;;  %1893 = vrcp.f32 %v1004_v53  ;;  %v1009_v20 = vadd.f32 1.0, %v1872_v15  ;;  %v2524_v37 = vpop.f32.mrb[26].mxu0  ;;  %v863_v56 = vmul.f32 1.442695, %v787_v21  ;;  %v2527_v22 = vadd.f32 %v2235_v36, %v655_v50 }
 0x10e   :  { %v1876_v28 = vpop.eup %1875  ;;  %1895 = vrcp.f32 %v977_v12  ;;  %v975_v43 = vadd.f32 1.0, %v1874_v42  ;;  %v2529_v45 = vpop.f32.mrb[26].mxu1  ;;  %v819_v51 = vsub.f32 0.0, %v2518_v55  ;;  %v2535_v60 = vadd.f32 %v2235_v36, %v687_v17 }
 0x10f   :  { %3036 = vst [vmem:[#allocation2_spill] sm:$0xff] %v2529_v45  ;;  %v2531_v26 = vpop.f32.mrb[27].mxu0  ;;  %v1878_v47 = vpop.eup %1877  ;;  %1897 = vrcp.f32 %v1009_v20  ;;  %v1007_v54 = vadd.f32 1.0, %v1876_v28  ;;  %v790_v53 = vsub.f32 0.0, %v2527_v22  ;;  %v653_v24 = vmul.f32 %v2230_v34, %v2359_v52 }
 0x110   :  { %3037 = vst [vmem:[#allocation3_spill] sm:$0xff] %v2531_v26  ;;  %v2537_v30 = vpop.f32.mrb[27].mxu1  ;;  %v1880_v19 = vpop.eup %1879  ;;  %1899 = vrcp.f32 %v975_v43  ;;  %v978_v0 = vadd.f32 1.0, %v1878_v47  ;;  %v927_v21 = vmul.f32 1.442695, %v819_v51  ;;  %v822_v50 = vsub.f32 0.0, %v2535_v60 }
 0x111   :  { %3038 = vst [vmem:[#allocation4_spill] sm:$0xff] %v2537_v30  ;;  %v1882_v15 = vpop.eup %1881  ;;  %v1102_v12 = vmul.f32 %v1880_v19, %v2297_v31  ;;  %1901 = vrcp.f32 %v1007_v54  ;;  %v869_v17 = vmul.f32 1.442695, %v790_v53  ;;  %v2545_v28 = vadd.f32 %v2235_v36, %v653_v24  ;;  %v2547_v52 = vpop.f32.mrb[28].mxu0 }
 0x112   :  { %v1884_v42 = vpop.eup %1883  ;;  %1903 = vrcp.f32 %v978_v0  ;;  %v1010_v20 = vadd.f32 1.0, %v1882_v15  ;;  %v933_v26 = vmul.f32 1.442695, %v822_v50  ;;  %v685_v51 = vmul.f32 %v2230_v34, %v2366_v2  ;;  %v2552_v19 = vpop.f32.mrb[28].mxu1 }
 0x113   :  { %v1886_v43 = vpop.eup %1885  ;;  %v1621_v47 = vpack.c.bf16 %v1102_v12, %v1102_v12  ;;  %v976_v30 = vadd.f32 1.0, %v1884_v42  ;;  %1905 = vpow2.f32 %v931_v61  ;;  %v788_v54 = vsub.f32 0.0, %v2545_v28  ;;  %v2554_v0 = vpop.f32.mrb[29].mxu0 }
 0x114   :  { %v1888_v45 = vpop.eup %1887  ;;  %1907 = vrcp.f32 %v1010_v20  ;;  %v1008_v31 = vadd.f32 1.0, %v1886_v43  ;;  %v658_v24 = vmul.f32 %v2379_v27, %v2230_v34  ;;  %v690_v15 = vmul.f32 %v2385_v39, %v2230_v34  ;;  %v2564_v12 = vpop.f32.mrb[29].mxu1 }
 0x115   :  { %v1890_v53 = vpop.eup %1889  ;;  %1423 = vst.msk [vmem:[%s3035_s4 + $0x1c] sm:$0xf] %vm1415_vm2, %v1621_v47  ;;  %1909 = vrcp.f32 %v976_v30  ;;  %v981_v61 = vadd.f32 1.0, %v1888_v45  ;;  %v2566_v2 = vpop.f32.mrb[30].mxu0  ;;  %v865_v20 = vmul.f32 1.442695, %v788_v54  ;;  %v2570_v43 = vadd.f32 %v2235_v36, %v685_v51 }
 0x116   :  { %3039 = vst [vmem:[#allocation5_spill] sm:$0xff] %v2566_v2  ;;  %v1892_v50 = vpop.eup %1891  ;;  %v1134_v42 = vmul.f32 %v1890_v53, %v2302_v35  ;;  %1911 = vrcp.f32 %v1008_v31  ;;  %v2572_v30 = vpop.f32.mrb[30].mxu1  ;;  %v2578_v39 = vadd.f32 %v2235_v36, %v658_v24  ;;  %v2581_v2 = vadd.f32 %v2235_v36, %v690_v15 }
 0x117   :  { %3040 = vst [vmem:[#allocation6_spill] sm:$0xff] %v2572_v30  ;;  %v2574_v45 = vpop.f32.mrb[31].mxu0  ;;  %v1894_v27 = vpop.eup %1893  ;;  %v1100_v47 = vmul.f32 %v1892_v50, %v2314_v58  ;;  %1913 = vrcp.f32 %v981_v61  ;;  %v820_v53 = vsub.f32 0.0, %v2570_v43 }
 0x118   :  { %3041 = vst [vmem:[#allocation7_spill] sm:$0xff] %v2574_v45  ;;  %v2583_v35 = vpop.f32.mrb[31].mxu1  ;;  %v1896_v31 = vpop.eup %1895  ;;  %v1653_v54 = vpack.c.bf16 %v1134_v42, %v1134_v42  ;;  %v1132_v51 = vmul.f32 %v1894_v27, %v2318_v3  ;;  %1915 = vpow2.f32 %v863_v56  ;;  %v793_v61 = vsub.f32 0.0, %v2578_v39 }
 0x119   :  { %v1898_v45 = vpop.eup %1897  ;;  %v1619_v30 = vpack.c.bf16 %v1100_v47, %v1100_v47  ;;  %v1105_v58 = vmul.f32 %v1896_v31, %v2325_v10  ;;  %1917 = vpow2.f32 %v927_v21  ;;  %v929_v3 = vmul.f32 1.442695, %v820_v53 }
 0x11a   :  { %v1900_v24 = vpop.eup %1899  ;;  %1455 = vst.msk [vmem:[%s3035_s4 + $0x9c] sm:$0xf] %vm1415_vm2, %v1653_v54  ;;  %v1651_v15 = vpack.c.bf16 %v1132_v51, %v1132_v51  ;;  %v1137_v50 = vmul.f32 %v1898_v45, %v2329_v14  ;;  %1919 = vpow2.f32 %v869_v17  ;;  %v875_v42 = vmul.f32 1.442695, %v793_v61 }
 0x11b   :  { %v1902_v56 = vpop.eup %1901  ;;  %1421 = vst.msk [vmem:[%s3035_s4 + $0x14] sm:$0xf] %vm1415_vm2, %v1619_v30  ;;  %v1624_v10 = vpack.c.bf16 %v1105_v58, %v1105_v58  ;;  %v1103_v21 = vmul.f32 %v1900_v24, %v2354_v46  ;;  %1921 = vpow2.f32 %v933_v26  ;;  %v825_v45 = vsub.f32 0.0, %v2581_v2 }
 0x11c   :  { %v1904_v27 = vpop.eup %1903  ;;  %1453 = vst.msk [vmem:[%s3035_s4 + $0x94] sm:$0xf] %vm1415_vm2, %v1651_v15  ;;  %v1656_v14 = vpack.c.bf16 %v1137_v50, %v1137_v50  ;;  %v1135_v17 = vmul.f32 %v1902_v56, %v2362_v59  ;;  %1923 = vpow2.f32 %v865_v20  ;;  %v656_v30 = vmul.f32 %v2230_v34, %v2387_v41 }
 0x11d   :  { %v1906_v47 = vpop.eup %1905  ;;  %1426 = vst.msk [vmem:[%s3035_s4 + $0x28] sm:$0xf] %vm1415_vm2, %v1624_v10  ;;  %v1622_v46 = vpack.c.bf16 %v1103_v21, %v1103_v21  ;;  %v1106_v26 = vmul.f32 %v1904_v27, %v2370_v8  ;;  %1925 = vpow2.f32 %v929_v3  ;;  %v939_v54 = vmul.f32 1.442695, %v825_v45 }
 0x11e   :  { %v1908_v31 = vpop.eup %1907  ;;  %1458 = vst.msk [vmem:[%s3035_s4 + $0xa8] sm:$0xf] %vm1415_vm2, %v1656_v14  ;;  %v1654_v59 = vpack.c.bf16 %v1135_v17, %v1135_v17  ;;  %v1013_v20 = vadd.f32 1.0, %v1906_v47  ;;  %1927 = vpow2.f32 %v875_v42  ;;  %v2622_v41 = vadd.f32 %v2235_v36, %v656_v30 }
 0x11f   :  { %v1910_v51 = vpop.eup %1909  ;;  %1424 = vst.msk [vmem:[%s3035_s4 + $0x20] sm:$0xf] %vm1415_vm2, %v1622_v46  ;;  %v1625_v8 = vpack.c.bf16 %v1106_v26, %v1106_v26  ;;  %v1138_v53 = vmul.f32 %v1908_v31, %v2375_v63  ;;  %v688_v58 = vmul.f32 %v2230_v34, %v2394_v4  ;;  %v659_v15 = vmul.f32 %v2396_v44, %v2230_v34 }
 0x120   :  { %v1912_v61 = vpop.eup %1911  ;;  %1456 = vst.msk [vmem:[%s3035_s4 + $0xa0] sm:$0xf] %vm1415_vm2, %v1654_v59  ;;  %v1104_v24 = vmul.f32 %v1910_v51, %v2383_v38  ;;  %1929 = vrcp.f32 %v1013_v20  ;;  %v691_v63 = vmul.f32 %v2401_v11, %v2230_v34  ;;  %v791_v56 = vsub.f32 0.0, %v2622_v41 }
 0x121   :  { %v1914_v50 = vpop.eup %1913  ;;  %1427 = vst.msk [vmem:[%s3035_s4 + $0x2c] sm:$0xf] %vm1415_vm2, %v1625_v8  ;;  %v1657_v4 = vpack.c.bf16 %v1138_v53, %v1138_v53  ;;  %v1136_v3 = vmul.f32 %v1912_v61, %v2408_v13  ;;  %1931 = vpow2.f32 %v939_v54  ;;  %v2643_v44 = vadd.f32 %v2235_v36, %v688_v58 }
 0x122   :  { %v1916_v38 = vpop.eup %1915  ;;  %v1623_v10 = vpack.c.bf16 %v1104_v24, %v1104_v24  ;;  %v1109_v21 = vmul.f32 %v1914_v50, %v2445_v40  ;;  %v2646_v11 = vadd.f32 %v2235_v36, %v659_v15  ;;  %v871_v14 = vmul.f32 1.442695, %v791_v56 }
 0x123   :  { %v1918_v42 = vpop.eup %1917  ;;  %1459 = vst.msk [vmem:[%s3035_s4 + $0xac] sm:$0xf] %vm1415_vm2, %v1657_v4  ;;  %v1655_v13 = vpack.c.bf16 %v1136_v3, %v1136_v3  ;;  %v979_v27 = vadd.f32 1.0, %v1916_v38  ;;  %v2653_v17 = vadd.f32 %v2235_v36, %v691_v63  ;;  %v823_v46 = vsub.f32 0.0, %v2643_v44 }
 0x124   :  { %v1920_v45 = vpop.eup %1919  ;;  %1425 = vst.msk [vmem:[%s3035_s4 + $0x24] sm:$0xf] %vm1415_vm2, %v1623_v10  ;;  %v1628_v40 = vpack.c.bf16 %v1109_v21, %v1109_v21  ;;  %v1011_v47 = vadd.f32 1.0, %v1918_v42  ;;  %v794_v26 = vsub.f32 0.0, %v2646_v11  ;;  %v657_v20 = vmul.f32 %v2230_v34, %v2403_v49 }
 0x125   :  { %v1922_v30 = vpop.eup %1921  ;;  %1457 = vst.msk [vmem:[%s3035_s4 + $0xa4] sm:$0xf] %vm1415_vm2, %v1655_v13  ;;  %1933 = vrcp.f32 %v979_v27  ;;  %v982_v31 = vadd.f32 1.0, %v1920_v45  ;;  %v826_v59 = vsub.f32 0.0, %v2653_v17  ;;  %v935_v8 = vmul.f32 1.442695, %v823_v46 }
 0x126   :  { %v1924_v54 = vpop.eup %1923  ;;  %1430 = vst.msk [vmem:[%s3035_s4 + $0x38] sm:$0xf] %vm1415_vm2, %v1628_v40  ;;  %1935 = vrcp.f32 %v1011_v47  ;;  %v1014_v51 = vadd.f32 1.0, %v1922_v30  ;;  %v877_v53 = vmul.f32 1.442695, %v794_v26  ;;  %v2673_v15 = vadd.f32 %v2235_v36, %v657_v20 }
 0x127   :  { %v1926_v58 = vpop.eup %1925  ;;  %1937 = vrcp.f32 %v982_v31  ;;  %v980_v61 = vadd.f32 1.0, %v1924_v54  ;;  %v941_v24 = vmul.f32 1.442695, %v826_v59  ;;  %v689_v50 = vmul.f32 %v2230_v34, %v2410_v16 }
 0x128   :  { %v1928_v63 = vpop.eup %1927  ;;  %1939 = vrcp.f32 %v1014_v51  ;;  %v1012_v49 = vadd.f32 1.0, %v1926_v58  ;;  %v662_v4 = vmul.f32 %v2438_v7, %v2230_v34  ;;  %v792_v56 = vsub.f32 0.0, %v2673_v15 }
 0x129   :  { %1941 = vrcp.f32 %v980_v61  ;;  %v985_v3 = vadd.f32 1.0, %v1928_v63  ;;  %v694_v38 = vmul.f32 %v2447_v62, %v2230_v34  ;;  %v2683_v21 = vadd.f32 %v2235_v36, %v689_v50 }
 0x12a   :  { %v1930_v10 = vpop.eup %1929  ;;  %1943 = vrcp.f32 %v1012_v49  ;;  %v2686_v42 = vadd.f32 %v2235_v36, %v662_v4  ;;  %v660_v16 = vmul.f32 %v2230_v34, %v2449_v9  ;;  %v873_v27 = vmul.f32 1.442695, %v792_v56 }
 0x12b   :  { %v1932_v13 = vpop.eup %1931  ;;  %v1141_v7 = vmul.f32 %v1930_v10, %v2481_v25  ;;  %1945 = vrcp.f32 %v985_v3  ;;  %v2692_v45 = vadd.f32 %v2235_v36, %v694_v38  ;;  %v824_v40 = vsub.f32 0.0, %v2683_v21 }
 0x12c   :  { %v1017_v62 = vadd.f32 1.0, %v1932_v13  ;;  %1947 = vpow2.f32 %v871_v14  ;;  %v797_v47 = vsub.f32 0.0, %v2686_v42  ;;  %v2698_v9 = vadd.f32 %v2235_v36, %v660_v16 }
 0x12d   :  { %v1660_v46 = vpack.c.bf16 %v1141_v7, %v1141_v7  ;;  %1949 = vpow2.f32 %v935_v8  ;;  %v829_v26 = vsub.f32 0.0, %v2692_v45  ;;  %v937_v25 = vmul.f32 1.442695, %v824_v40 }
 0x12e   :  { %1951 = vrcp.f32 %v1017_v62  ;;  %v883_v30 = vmul.f32 1.442695, %v797_v47  ;;  %v692_v31 = vmul.f32 %v2230_v34, %v2458_v5  ;;  %v795_v20 = vsub.f32 0.0, %v2698_v9 }
 0x12f   :  { %v1934_v59 = vpop.eup %1933  ;;  %1462 = vst.msk [vmem:[%s3035_s4 + $0xb8] sm:$0xf] %vm1415_vm2, %v1660_v46  ;;  %1953 = vpow2.f32 %v877_v53  ;;  %v947_v14 = vmul.f32 1.442695, %v829_v26  ;;  %v663_v54 = vmul.f32 %v2460_v6, %v2230_v34  ;;  %v695_v5 = vmul.f32 %v2470_v32, %v2230_v34 }
 0x130   :  { %v1936_v51 = vpop.eup %1935  ;;  %v1107_v8 = vmul.f32 %v1934_v59, %v2496_v29  ;;  %1955 = vpow2.f32 %v941_v24  ;;  %v2711_v58 = vadd.f32 %v2235_v36, %v692_v31  ;;  %v879_v53 = vmul.f32 1.442695, %v795_v20 }
 0x131   :  { %v1938_v61 = vpop.eup %1937  ;;  %v1139_v63 = vmul.f32 %v1936_v51, %v2518_v55  ;;  %1957 = vpow2.f32 %v873_v27  ;;  %v2717_v49 = vadd.f32 %v2235_v36, %v663_v54  ;;  %v2741_v27 = vld [vmem:[%s3034_s3] ss:$0 sm:$0xff] }
 0x132   :  { %v1940_v50 = vpop.eup %1939  ;;  %v1626_v6 = vpack.c.bf16 %v1107_v8, %v1107_v8  ;;  %v1110_v4 = vmul.f32 %v1938_v61, %v2527_v22  ;;  %1959 = vpow2.f32 %v937_v25  ;;  %v827_v29 = vsub.f32 0.0, %v2711_v58 }
 0x133   :  { %v1942_v24 = vpop.eup %1941  ;;  %v1658_v3 = vpack.c.bf16 %v1139_v63, %v1139_v63  ;;  %v1142_v56 = vmul.f32 %v1940_v50, %v2535_v60  ;;  %1961 = vpow2.f32 %v883_v30  ;;  %v798_v34 = vsub.f32 0.0, %v2717_v49 }
 0x134   :  { %v1944_v32 = vpop.eup %1943  ;;  %1428 = vst.msk [vmem:[%s3035_s4 + $0x30] sm:$0xf] %vm1415_vm2, %v1626_v6  ;;  %v1629_v36 = vpack.c.bf16 %v1110_v4, %v1110_v4  ;;  %v1108_v55 = vmul.f32 %v1942_v24, %v2545_v28  ;;  %1963 = vpow2.f32 %v947_v14  ;;  %v943_v22 = vmul.f32 1.442695, %v827_v29 }
 0x135   :  { %v1946_v38 = vpop.eup %1945  ;;  %1460 = vst.msk [vmem:[%s3035_s4 + $0xb0] sm:$0xf] %vm1415_vm2, %v1658_v3  ;;  %v1661_v60 = vpack.c.bf16 %v1142_v56, %v1142_v56  ;;  %v1140_v10 = vmul.f32 %v1944_v32, %v2570_v43  ;;  %1965 = vpow2.f32 %v879_v53  ;;  %v885_v16 = vmul.f32 1.442695, %v798_v34 }
 0x136   :  { %v1948_v13 = vpop.eup %1947  ;;  %1431 = vst.msk [vmem:[%s3035_s4 + $0x3c] sm:$0xf] %vm1415_vm2, %v1629_v36  ;;  %v1627_v28 = vpack.c.bf16 %v1108_v55, %v1108_v55  ;;  %v1113_v7 = vmul.f32 %v1946_v38, %v2578_v39  ;;  %1967 = vpow2.f32 %v943_v22  ;;  %v2744_v62 = vadd.f32 %v2741_v27, %v695_v5  ;;  %v2753_v39 = vld [vmem:[%s3033_s2] ss:$0 sm:$0xff] }
 0x137   :  { %v1950_v43 = vpop.eup %1949  ;;  %1463 = vst.msk [vmem:[%s3035_s4 + $0xbc] sm:$0xf] %vm1415_vm2, %v1661_v60  ;;  %v1659_v40 = vpack.c.bf16 %v1140_v10, %v1140_v10  ;;  %v983_v47 = vadd.f32 1.0, %v1948_v13  ;;  %1969 = vpow2.f32 %v885_v16  ;;  %v661_v46 = vmul.f32 %v2753_v39, %v2472_v33 }
 0x138   :  { %v1952_v26 = vpop.eup %1951  ;;  %1429 = vst.msk [vmem:[%s3035_s4 + $0x34] sm:$0xf] %vm1415_vm2, %v1627_v28  ;;  %v1632_v25 = vpack.c.bf16 %v1113_v7, %v1113_v7  ;;  %v1015_v30 = vadd.f32 1.0, %v1950_v43  ;;  %v830_v31 = vsub.f32 0.0, %v2744_v62  ;;  %v693_v59 = vmul.f32 %v2753_v39, %v2483_v48 }
 0x139   :  { %v1954_v14 = vpop.eup %1953  ;;  %1461 = vst.msk [vmem:[%s3035_s4 + $0xb4] sm:$0xf] %vm1415_vm2, %v1659_v40  ;;  %v1145_v33 = vmul.f32 %v1952_v26, %v2581_v2  ;;  %1971 = vrcp.f32 %v983_v47  ;;  %v2770_v20 = vadd.f32 %v2741_v27, %v661_v46  ;;  %v666_v54 = vmul.f32 %v2753_v39, %v2504_v1 }
 0x13a   :  { %v1956_v51 = vpop.eup %1955  ;;  %1434 = vst.msk [vmem:[%s3035_s4 + $0x48] sm:$0xf] %vm1415_vm2, %v1632_v25  ;;  %1973 = vrcp.f32 %v1015_v30  ;;  %v986_v48 = vadd.f32 1.0, %v1954_v14  ;;  %v949_v8 = vmul.f32 1.442695, %v830_v31  ;;  %v2779_v5 = vadd.f32 %v2741_v27, %v693_v59  ;;  %v3042_v59 = vld [vmem:[#allocation2_spill] sm:$0xff] }
 0x13b   :  { %v1958_v2 = vpop.eup %1957  ;;  %v1664_v61 = vpack.c.bf16 %v1145_v33, %v1145_v33  ;;  %v1018_v63 = vadd.f32 1.0, %v1956_v51  ;;  %v796_v53 = vsub.f32 0.0, %v2770_v20  ;;  %v2783_v50 = vadd.f32 %v2741_v27, %v666_v54  ;;  %v3043_v51 = vld [vmem:[#allocation3_spill] sm:$0xff] }
 0x13c   :  { %v1960_v1 = vpop.eup %1959  ;;  %1975 = vrcp.f32 %v986_v48  ;;  %v984_v6 = vadd.f32 1.0, %v1958_v2  ;;  %v828_v4 = vsub.f32 0.0, %v2779_v5  ;;  %v698_v29 = vmul.f32 %v2753_v39, %v2513_v57 }
 0x13d   :  { %v1962_v24 = vpop.eup %1961  ;;  %1466 = vst.msk [vmem:[%s3035_s4 + $0xc8] sm:$0xf] %vm1415_vm2, %v1664_v61  ;;  %1977 = vrcp.f32 %v1018_v63  ;;  %v1016_v3 = vadd.f32 1.0, %v1960_v1  ;;  %v881_v56 = vmul.f32 1.442695, %v796_v53  ;;  %v801_v34 = vsub.f32 0.0, %v2783_v50 }
 0x13e   :  { %v1964_v32 = vpop.eup %1963  ;;  %1979 = vrcp.f32 %v984_v6  ;;  %v989_v36 = vadd.f32 1.0, %v1962_v24  ;;  %v945_v55 = vmul.f32 1.442695, %v828_v4  ;;  %v2794_v22 = vadd.f32 %v2741_v27, %v698_v29 }
 0x13f   :  { %v1966_v38 = vpop.eup %1965  ;;  %1981 = vrcp.f32 %v1016_v3  ;;  %v1021_v57 = vadd.f32 1.0, %v1964_v32  ;;  %v891_v60 = vmul.f32 1.442695, %v801_v34  ;;  %v664_v10 = vmul.f32 %v2753_v39, %v2515_v18 }
 0x140   :  { %v1968_v16 = vpop.eup %1967  ;;  %1983 = vrcp.f32 %v989_v36  ;;  %v987_v13 = vadd.f32 1.0, %v1966_v38  ;;  %v833_v28 = vsub.f32 0.0, %v2794_v22  ;;  %v696_v7 = vmul.f32 %v2753_v39, %v2522_v23 }
 0x141   :  { %v1970_v43 = vpop.eup %1969  ;;  %1985 = vrcp.f32 %v1021_v57  ;;  %v1019_v40 = vadd.f32 1.0, %v1968_v16  ;;  %v2802_v47 = vadd.f32 %v2741_v27, %v664_v10  ;;  %v667_v46 = vmul.f32 %v2753_v39, %v2524_v37 }
 0x142   :  { %1987 = vrcp.f32 %v987_v13  ;;  %v990_v26 = vadd.f32 1.0, %v1970_v43  ;;  %v955_v18 = vmul.f32 1.442695, %v833_v28  ;;  %v2807_v25 = vadd.f32 %v2741_v27, %v696_v7 }
 0x143   :  { %v1972_v30 = vpop.eup %1971  ;;  %1989 = vrcp.f32 %v1019_v40  ;;  %v799_v31 = vsub.f32 0.0, %v2802_v47  ;;  %v2811_v23 = vadd.f32 %v2741_v27, %v667_v46  ;;  %v699_v14 = vmul.f32 %v2753_v39, %v3042_v59 }
 0x144   :  { %v1974_v33 = vpop.eup %1973  ;;  %v1111_v54 = vmul.f32 %v1972_v30, %v2622_v41  ;;  %1991 = vrcp.f32 %v990_v26  ;;  %v831_v37 = vsub.f32 0.0, %v2807_v25  ;;  %v665_v48 = vmul.f32 %v2753_v39, %v3043_v51 }
 0x145   :  { %v1143_v2 = vmul.f32 %v1974_v33, %v2643_v44  ;;  %1993 = vpow2.f32 %v949_v8  ;;  %v887_v61 = vmul.f32 1.442695, %v799_v31  ;;  %v802_v63 = vsub.f32 0.0, %v2811_v23 }
 0x146   :  { %v1976_v53 = vpop.eup %1975  ;;  %v1630_v1 = vpack.c.bf16 %v1111_v54, %v1111_v54  ;;  %1995 = vpow2.f32 %v881_v56  ;;  %v951_v6 = vmul.f32 1.442695, %v831_v37  ;;  %v2822_v4 = vadd.f32 %v2741_v27, %v699_v14 }
 0x147   :  { %v1978_v41 = vpop.eup %1977  ;;  %v1662_v29 = vpack.c.bf16 %v1143_v2, %v1143_v2  ;;  %v1114_v24 = vmul.f32 %v1976_v53, %v2646_v11  ;;  %1997 = vpow2.f32 %v945_v55  ;;  %v893_v3 = vmul.f32 1.442695, %v802_v63  ;;  %v3044_v55 = vld [vmem:[#allocation4_spill] sm:$0xff] }
 0x148   :  { %v1980_v34 = vpop.eup %1979  ;;  %1432 = vst.msk [vmem:[%s3035_s4 + $0x40] sm:$0xf] %vm1415_vm2, %v1630_v1  ;;  %v1146_v44 = vmul.f32 %v1978_v41, %v2653_v17  ;;  %1999 = vpow2.f32 %v891_v60  ;;  %v834_v8 = vsub.f32 0.0, %v2822_v4  ;;  %v2832_v56 = vadd.f32 %v2741_v27, %v665_v48 }
 0x149   :  { %v1982_v32 = vpop.eup %1981  ;;  %1464 = vst.msk [vmem:[%s3035_s4 + $0xc0] sm:$0xf] %vm1415_vm2, %v1662_v29  ;;  %v1633_v11 = vpack.c.bf16 %v1114_v24, %v1114_v24  ;;  %v1112_v36 = vmul.f32 %v1980_v34, %v2673_v15  ;;  %2001 = vpow2.f32 %v955_v18  ;;  %v697_v38 = vmul.f32 %v2753_v39, %v3044_v55 }
 0x14a   :  { %v1984_v17 = vpop.eup %1983  ;;  %v1665_v57 = vpack.c.bf16 %v1146_v44, %v1146_v44  ;;  %v1144_v60 = vmul.f32 %v1982_v32, %v2683_v21  ;;  %2003 = vpow2.f32 %v887_v61  ;;  %v957_v10 = vmul.f32 1.442695, %v834_v8 }
 0x14b   :  { %v1986_v16 = vpop.eup %1985  ;;  %1435 = vst.msk [vmem:[%s3035_s4 + $0x4c] sm:$0xf] %vm1415_vm2, %v1633_v11  ;;  %v1631_v13 = vpack.c.bf16 %v1112_v36, %v1112_v36  ;;  %v1117_v28 = vmul.f32 %v1984_v17, %v2686_v42  ;;  %2005 = vpow2.f32 %v951_v6  ;;  %v800_v15 = vsub.f32 0.0, %v2832_v56 }
 0x14c   :  { %v1988_v7 = vpop.eup %1987  ;;  %1467 = vst.msk [vmem:[%s3035_s4 + $0xcc] sm:$0xf] %vm1415_vm2, %v1665_v57  ;;  %v1663_v21 = vpack.c.bf16 %v1144_v60, %v1144_v60  ;;  %v1149_v43 = vmul.f32 %v1986_v16, %v2692_v45  ;;  %2007 = vpow2.f32 %v893_v3  ;;  %v2854_v40 = vadd.f32 %v2741_v27, %v697_v38  ;;  %v3045_v57 = vld [vmem:[#allocation5_spill] sm:$0xff] }
 0x14d   :  { %v1990_v46 = vpop.eup %1989  ;;  %1433 = vst.msk [vmem:[%s3035_s4 + $0x44] sm:$0xf] %vm1415_vm2, %v1631_v13  ;;  %v1636_v42 = vpack.c.bf16 %v1117_v28, %v1117_v28  ;;  %v1115_v26 = vmul.f32 %v1988_v7, %v2698_v9  ;;  %2009 = vpow2.f32 %v957_v10  ;;  %v889_v18 = vmul.f32 1.442695, %v800_v15  ;;  %v3046_v28 = vld [vmem:[#allocation6_spill] sm:$0xff] }
 0x14e   :  { %v1992_v30 = vpop.eup %1991  ;;  %1465 = vst.msk [vmem:[%s3035_s4 + $0xc4] sm:$0xf] %vm1415_vm2, %v1663_v21  ;;  %v1668_v45 = vpack.c.bf16 %v1149_v43, %v1149_v43  ;;  %v1147_v31 = vmul.f32 %v1990_v46, %v2711_v58  ;;  %v670_v59 = vmul.f32 %v2753_v39, %v2547_v52  ;;  %v702_v54 = vmul.f32 %v2753_v39, %v2552_v19 }
 0x14f   :  { %v1994_v14 = vpop.eup %1993  ;;  %1438 = vst.msk [vmem:[%s3035_s4 + $0x58] sm:$0xf] %vm1415_vm2, %v1636_v42  ;;  %v1634_v9 = vpack.c.bf16 %v1115_v26, %v1115_v26  ;;  %v1118_v33 = vmul.f32 %v1992_v30, %v2717_v49  ;;  %2011 = vpow2.f32 %v889_v18  ;;  %v832_v51 = vsub.f32 0.0, %v2854_v40  ;;  %v3047_v26 = vld [vmem:[#allocation7_spill] sm:$0xff] }
 0x150   :  { %v1996_v37 = vpop.eup %1995  ;;  %1470 = vst.msk [vmem:[%s3035_s4 + $0xd8] sm:$0xf] %vm1415_vm2, %v1668_v45  ;;  %v1666_v52 = vpack.c.bf16 %v1147_v31, %v1147_v31  ;;  %v1022_v58 = vadd.f32 1.0, %v1994_v14  ;;  %v2881_v48 = vadd.f32 %v2741_v27, %v670_v59  ;;  %v2888_v61 = vadd.f32 %v2741_v27, %v702_v54 }
 0x151   :  { %v1998_v2 = vpop.eup %1997  ;;  %1436 = vst.msk [vmem:[%s3035_s4 + $0x50] sm:$0xf] %vm1415_vm2, %v1634_v9  ;;  %v1637_v19 = vpack.c.bf16 %v1118_v33, %v1118_v33  ;;  %v988_v49 = vadd.f32 1.0, %v1996_v37  ;;  %v668_v63 = vmul.f32 %v2753_v39, %v2554_v0  ;;  %v700_v41 = vmul.f32 %v2753_v39, %v2564_v12 }
 0x152   :  { %v2000_v53 = vpop.eup %1999  ;;  %1468 = vst.msk [vmem:[%s3035_s4 + $0xd0] sm:$0xf] %vm1415_vm2, %v1666_v52  ;;  %2013 = vrcp.f32 %v1022_v58  ;;  %v1020_v1 = vadd.f32 1.0, %v1998_v2  ;;  %v805_v6 = vsub.f32 0.0, %v2881_v48  ;;  %v837_v24 = vsub.f32 0.0, %v2888_v61 }
 0x153   :  { %v2002_v29 = vpop.eup %2001  ;;  %1439 = vst.msk [vmem:[%s3035_s4 + $0x5c] sm:$0xf] %vm1415_vm2, %v1637_v19  ;;  %2015 = vrcp.f32 %v988_v49  ;;  %v993_v0 = vadd.f32 1.0, %v2000_v53  ;;  %v2905_v3 = vadd.f32 %v2741_v27, %v668_v63  ;;  %v2908_v8 = vadd.f32 %v2741_v27, %v700_v41 }
 0x154   :  { %v2004_v34 = vpop.eup %2003  ;;  %2017 = vrcp.f32 %v1020_v1  ;;  %v1025_v44 = vadd.f32 1.0, %v2002_v29  ;;  %v953_v11 = vmul.f32 1.442695, %v832_v51  ;;  %v899_v36 = vmul.f32 1.442695, %v805_v6 }
 0x155   :  { %v2006_v12 = vpop.eup %2005  ;;  %2019 = vrcp.f32 %v993_v0  ;;  %v991_v32 = vadd.f32 1.0, %v2004_v34  ;;  %v803_v17 = vsub.f32 0.0, %v2905_v3  ;;  %v671_v60 = vmul.f32 %v2753_v39, %v3045_v57 }
 0x156   :  { %v2008_v55 = vpop.eup %2007  ;;  %2021 = vrcp.f32 %v1025_v44  ;;  %v1023_v38 = vadd.f32 1.0, %v2006_v12  ;;  %v963_v13 = vmul.f32 1.442695, %v837_v24  ;;  %v703_v15 = vmul.f32 %v2753_v39, %v3046_v28 }
 0x157   :  { %v2010_v10 = vpop.eup %2009  ;;  %2023 = vrcp.f32 %v991_v32  ;;  %v994_v16 = vadd.f32 1.0, %v2008_v55  ;;  %v835_v21 = vsub.f32 0.0, %v2908_v8  ;;  %v2917_v43 = vadd.f32 %v2741_v27, %v671_v60 }
 0x158   :  { %2025 = vrcp.f32 %v1023_v38  ;;  %v1026_v7 = vadd.f32 1.0, %v2010_v10  ;;  %v2920_v42 = vadd.f32 %v2741_v27, %v703_v15  ;;  %v669_v18 = vmul.f32 %v2753_v39, %v3047_v26 }
 0x159   :  { %v2012_v46 = vpop.eup %2011  ;;  %2027 = vrcp.f32 %v994_v16  ;;  %v701_v30 = vmul.f32 %v2753_v39, %v2583_v35  ;;  %v895_v31 = vmul.f32 1.442695, %v803_v17  ;;  %v806_v59 = vsub.f32 0.0, %v2917_v43 }
 0x15a   :  { %2029 = vrcp.f32 %v1026_v7  ;;  %v992_v45 = vadd.f32 1.0, %v2012_v46  ;;  %v838_v14 = vsub.f32 0.0, %v2920_v42  ;;  %v2929_v9 = vadd.f32 %v2741_v27, %v669_v18 }
 0x15b   :  { %2031 = vpow2.f32 %v953_v11  ;;  %v2932_v33 = vadd.f32 %v2741_v27, %v701_v30  ;;  %v959_v37 = vmul.f32 1.442695, %v835_v21  ;;  %v901_v39 = vmul.f32 1.442695, %v806_v59 }
 0x15c   :  { %v2014_v54 = vpop.eup %2013  ;;  %2033 = vrcp.f32 %v992_v45  ;;  %v804_v58 = vsub.f32 0.0, %v2929_v9  ;;  %v965_v19 = vmul.f32 1.442695, %v838_v14 }
 0x15d   :  { %v2016_v52 = vpop.eup %2015  ;;  %v1150_v35 = vmul.f32 %v2014_v54, %v2744_v62  ;;  %2035 = vpow2.f32 %v899_v36  ;;  %v836_v49 = vsub.f32 0.0, %v2932_v33 }
 0x15e   :  { %v2018_v51 = vpop.eup %2017  ;;  %v1116_v2 = vmul.f32 %v2016_v52, %v2770_v20  ;;  %2037 = vpow2.f32 %v963_v13  ;;  %v897_v1 = vmul.f32 1.442695, %v804_v58 }
 0x15f   :  { %v2020_v63 = vpop.eup %2019  ;;  %v1669_v27 = vpack.c.bf16 %v1150_v35, %v1150_v35  ;;  %v1148_v53 = vmul.f32 %v2018_v51, %v2779_v5  ;;  %2039 = vpow2.f32 %v895_v31  ;;  %v961_v29 = vmul.f32 1.442695, %v836_v49 }
 0x160   :  { %v2022_v6 = vpop.eup %2021  ;;  %v1635_v41 = vpack.c.bf16 %v1116_v2, %v1116_v2  ;;  %v1121_v62 = vmul.f32 %v2020_v63, %v2783_v50  ;;  %2041 = vpow2.f32 %v959_v37 }
 0x161   :  { %v2024_v0 = vpop.eup %2023  ;;  %1471 = vst.msk [vmem:[%s3035_s4 + $0xdc] sm:$0xf] %vm1415_vm2, %v1669_v27  ;;  %v1667_v20 = vpack.c.bf16 %v1148_v53, %v1148_v53  ;;  %v1153_v24 = vmul.f32 %v2022_v6, %v2794_v22  ;;  %2043 = vpow2.f32 %v901_v39 }
 0x162   :  { %v2026_v34 = vpop.eup %2025  ;;  %1437 = vst.msk [vmem:[%s3035_s4 + $0x54] sm:$0xf] %vm1415_vm2, %v1635_v41  ;;  %v1640_v5 = vpack.c.bf16 %v1121_v62, %v1121_v62  ;;  %v1119_v50 = vmul.f32 %v2024_v0, %v2802_v47  ;;  %2045 = vpow2.f32 %v965_v19 }
 0x163   :  { %v2028_v44 = vpop.eup %2027  ;;  %1469 = vst.msk [vmem:[%s3035_s4 + $0xd4] sm:$0xf] %vm1415_vm2, %v1667_v20  ;;  %v1672_v12 = vpack.c.bf16 %v1153_v24, %v1153_v24  ;;  %v1151_v22 = vmul.f32 %v2026_v34, %v2807_v25  ;;  %2047 = vpow2.f32 %v897_v1 }
 0x164   :  { %v2030_v32 = vpop.eup %2029  ;;  %1442 = vst.msk [vmem:[%s3035_s4 + $0x68] sm:$0xf] %vm1415_vm2, %v1640_v5  ;;  %v1638_v11 = vpack.c.bf16 %v1119_v50, %v1119_v50  ;;  %v1122_v47 = vmul.f32 %v2028_v44, %v2811_v23  ;;  %2049 = vpow2.f32 %v961_v29 }
 0x165   :  { %v2032_v36 = vpop.eup %2031  ;;  %1474 = vst.msk [vmem:[%s3035_s4 + $0xe8] sm:$0xf] %vm1415_vm2, %v1672_v12  ;;  %v1670_v55 = vpack.c.bf16 %v1151_v22, %v1151_v22  ;;  %v1154_v25 = vmul.f32 %v2030_v32, %v2822_v4 }
 0x166   :  { %v2034_v38 = vpop.eup %2033  ;;  %1440 = vst.msk [vmem:[%s3035_s4 + $0x60] sm:$0xf] %vm1415_vm2, %v1638_v11  ;;  %v1641_v17 = vpack.c.bf16 %v1122_v47, %v1122_v47  ;;  %v1024_v57 = vadd.f32 1.0, %v2032_v36 }
 0x167   :  { %v2036_v60 = vpop.eup %2035  ;;  %1472 = vst.msk [vmem:[%s3035_s4 + $0xe0] sm:$0xf] %vm1415_vm2, %v1670_v55  ;;  %v1673_v23 = vpack.c.bf16 %v1154_v25, %v1154_v25  ;;  %v1120_v10 = vmul.f32 %v2034_v38, %v2832_v56 }
 0x168   :  { %v2038_v16 = vpop.eup %2037  ;;  %1443 = vst.msk [vmem:[%s3035_s4 + $0x6c] sm:$0xf] %vm1415_vm2, %v1641_v17  ;;  %2051 = vrcp.f32 %v1024_v57  ;;  %v997_v4 = vadd.f32 1.0, %v2036_v60 }
 0x169   :  { %v2040_v13 = vpop.eup %2039  ;;  %1475 = vst.msk [vmem:[%s3035_s4 + $0xec] sm:$0xf] %vm1415_vm2, %v1673_v23  ;;  %v1639_v28 = vpack.c.bf16 %v1120_v10, %v1120_v10  ;;  %v1029_v15 = vadd.f32 1.0, %v2038_v16 }
 0x16a   :  { %v2042_v7 = vpop.eup %2041  ;;  %2053 = vrcp.f32 %v997_v4  ;;  %v995_v21 = vadd.f32 1.0, %v2040_v13 }
 0x16b   :  { %v2044_v56 = vpop.eup %2043  ;;  %1441 = vst.msk [vmem:[%s3035_s4 + $0x64] sm:$0xf] %vm1415_vm2, %v1639_v28  ;;  %2055 = vrcp.f32 %v1029_v15  ;;  %v1027_v46 = vadd.f32 1.0, %v2042_v7 }
 0x16c   :  { %v2046_v26 = vpop.eup %2045  ;;  %2057 = vrcp.f32 %v995_v21  ;;  %v998_v18 = vadd.f32 1.0, %v2044_v56 }
 0x16d   :  { %v2048_v30 = vpop.eup %2047  ;;  %2059 = vrcp.f32 %v1027_v46  ;;  %v1030_v45 = vadd.f32 1.0, %v2046_v26 }
 0x16e   :  { %v2050_v31 = vpop.eup %2049  ;;  %2061 = vrcp.f32 %v998_v18  ;;  %v996_v59 = vadd.f32 1.0, %v2048_v30 }
 0x16f   :  { %2063 = vrcp.f32 %v1030_v45  ;;  %v1028_v14 = vadd.f32 1.0, %v2050_v31 }
 0x170   :  { %2065 = vrcp.f32 %v996_v59 }
 0x171   :  { %2067 = vrcp.f32 %v1028_v14 }
 0x172   :  { %v2052_v54 = vpop.eup %2051 }
 0x173   :  { %v1152_v37 = vmul.f32 %v2052_v54, %v2854_v40 }
 0x174   :  { %v2054_v52 = vpop.eup %2053 }
 0x175   :  { %v2056_v35 = vpop.eup %2055  ;;  %v1671_v39 = vpack.c.bf16 %v1152_v37, %v1152_v37  ;;  %v1125_v58 = vmul.f32 %v2054_v52, %v2881_v48 }
 0x176   :  { %v2058_v51 = vpop.eup %2057  ;;  %v1157_v2 = vmul.f32 %v2056_v35, %v2888_v61 }
 0x177   :  { %v2060_v19 = vpop.eup %2059  ;;  %1473 = vst.msk [vmem:[%s3035_s4 + $0xe4] sm:$0xf] %vm1415_vm2, %v1671_v39  ;;  %v1644_v49 = vpack.c.bf16 %v1125_v58, %v1125_v58  ;;  %v1123_v63 = vmul.f32 %v2058_v51, %v2905_v3 }
 0x178   :  { %v2062_v27 = vpop.eup %2061  ;;  %v1676_v53 = vpack.c.bf16 %v1157_v2, %v1157_v2  ;;  %v1155_v40 = vmul.f32 %v2060_v19, %v2908_v8 }
 0x179   :  { %v2064_v1 = vpop.eup %2063  ;;  %1446 = vst.msk [vmem:[%s3035_s4 + $0x78] sm:$0xf] %vm1415_vm2, %v1644_v49  ;;  %v1642_v48 = vpack.c.bf16 %v1123_v63, %v1123_v63  ;;  %v1126_v61 = vmul.f32 %v2062_v27, %v2917_v43 }
 0x17a   :  { %v2066_v6 = vpop.eup %2065  ;;  %1478 = vst.msk [vmem:[%s3035_s4 + $0xf8] sm:$0xf] %vm1415_vm2, %v1676_v53  ;;  %v1674_v3 = vpack.c.bf16 %v1155_v40, %v1155_v40  ;;  %v1158_v41 = vmul.f32 %v2064_v1, %v2920_v42 }
 0x17b   :  { %v2068_v62 = vpop.eup %2067  ;;  %1444 = vst.msk [vmem:[%s3035_s4 + $0x70] sm:$0xf] %vm1415_vm2, %v1642_v48  ;;  %v1645_v8 = vpack.c.bf16 %v1126_v61, %v1126_v61  ;;  %v1124_v29 = vmul.f32 %v2066_v6, %v2929_v9 }
 0x17c   :  { %1476 = vst.msk [vmem:[%s3035_s4 + $0xf0] sm:$0xf] %vm1415_vm2, %v1674_v3  ;;  %v1677_v43 = vpack.c.bf16 %v1158_v41, %v1158_v41  ;;  %v1156_v0 = vmul.f32 %v2068_v62, %v2932_v33 }
 0x17d   :  { %1447 = vst.msk [vmem:[%s3035_s4 + $0x7c] sm:$0xf] %vm1415_vm2, %v1645_v8  ;;  %v1643_v42 = vpack.c.bf16 %v1124_v29, %v1124_v29 }
 0x17e   :  { %1479 = vst.msk [vmem:[%s3035_s4 + $0xfc] sm:$0xf] %vm1415_vm2, %v1677_v43  ;;  %v1675_v9 = vpack.c.bf16 %v1156_v0, %v1156_v0 }
 0x17f   :  { %1445 = vst.msk [vmem:[%s3035_s4 + $0x74] sm:$0xf] %vm1415_vm2, %v1643_v42 }
 0x180   :  { %1477 = vst.msk [vmem:[%s3035_s4 + $0xf4] sm:$0xf] %vm1415_vm2, %v1675_v9 }

</bundles_post_ra>
